<compile_context>
chip_gen: v7x
topology: tpu7x:2x2x1
jax: 0.10.0
libtpu: 0.0.40
codegen_flags: <defaults>
</compile_context>

<pallas_src>
from functools import partial

import jax
import jax.numpy as jnp
from jax.experimental import pallas as pl
from jax.experimental.pallas import tpu as pltpu


def qvalue_kernel(x_ref, w1_ref, b1_ref, w2_ref, b2_ref, w3r_ref, b3_ref,
                  o_ref, *, matmul_dtype):
    # fc1 + relu: (TB, D) @ (D, H) -> (TB, H). bf16 MXU operands, f32 accumulate.
    h1 = jnp.dot(x_ref[...].astype(matmul_dtype), w1_ref[...],
                 preferred_element_type=jnp.float32)
    h1 = jnp.maximum(h1 + b1_ref[...], 0.0)

    # fc2 + relu: (TB, H) @ (H, H) -> (TB, H).
    h2 = jnp.dot(h1.astype(matmul_dtype), w2_ref[...],
                 preferred_element_type=jnp.float32)
    h2 = jnp.maximum(h2 + b2_ref[...], 0.0)

    # fc3 (out_features == 1), lane-dense: contract (1, H) with (TB, H) over H
    # (the standard q @ k.T MXU form) -> (1, TB) with batch on the lane axis.
    out = jax.lax.dot_general(w3r_ref[...], h2, (((1,), (1,)), ((), ())),
                              preferred_element_type=jnp.float32)
    out = out + b3_ref[...]                      # (1, TB) + (1, 1) broadcast
    o_ref[...] = out.reshape(o_ref.shape).astype(o_ref.dtype)


def _round_up(n, m):
    return ((n + m - 1) // m) * m


def _pick_batch_tile(B, block_b):
    # Aim for >= 2 grid steps (both v7x TensorCores busy) and 128-aligned,
    # lane-dense tiles, but never exceed block_b or the 8-rounded batch.
    tb = _round_up(max(1, -(-B // 2)), 128)      # ~ceil(B/2), 128-aligned
    tb = min(tb, block_b, _round_up(B, 8))
    return max(8, _round_up(tb, 8))


def qvalue_forward(x, params, *, block_b=4096, matmul_dtype=jnp.bfloat16):
    """x: [B, total_dims]. params: w1,b1,w2,b2,w3,b3 (f32, W as [in, out])."""
    B, D = x.shape
    H = params["w1"].shape[1]

    TB = _pick_batch_tile(B, block_b)
    n_blocks = pl.cdiv(B, TB)        # ragged last block -> masked reads/writes

    # Weights cast to the MXU dtype once here (not re-cast every grid step).
    w1 = params["w1"].astype(matmul_dtype)
    w2 = params["w2"].astype(matmul_dtype)
    b1, b2 = params["b1"], params["b2"]
    w3r = params["w3"].reshape(1, H).astype(jnp.float32)  # (H,1) -> (1,H) row
    b3 = params["b3"].reshape(1, 1)

    # Weights/biases: same block every grid step -> fetched once, VMEM-resident.
    resident = lambda a: pl.BlockSpec(a.shape, lambda i: (0,) * a.ndim)

    out = pl.pallas_call(
        partial(qvalue_kernel, matmul_dtype=matmul_dtype),
        out_shape=jax.ShapeDtypeStruct((n_blocks, 1, TB), jnp.float32),
        grid=(n_blocks,),
        in_specs=[
            pl.BlockSpec((TB, D), lambda i: (i, 0)),   # x: tiled over batch
            resident(w1), resident(b1),
            resident(w2), resident(b2),
            resident(w3r), resident(b3),
        ],
        out_specs=pl.BlockSpec((1, 1, TB), lambda i: (i, 0, 0)),  # lane-dense
        compiler_params=pltpu.CompilerParams(
            dimension_semantics=("parallel",),         # megacore sharding (v7x)
            vmem_limit_bytes=48 * 1024 * 1024),
    )(x, w1, b1, w2, b2, w3r, b3)

    # (n_blocks, 1, TB) lane-major -> (B, 1); garbage rows from the ragged
    # final block (indices >= B) are dropped here.
    return out.reshape(n_blocks * TB, 1)[:B]


def init_params(key, total_dims, hidden_dim):
    """Deterministic init mimicking PyTorch Linear default U[-1/sqrt(fan_in), +]."""
    ks = jax.random.split(key, 6)

    def lin(kw, kb, fan_in, fan_out):
        bound = 1.0 / jnp.sqrt(fan_in)
        w = jax.random.uniform(kw, (fan_in, fan_out), jnp.float32, -bound, bound)
        b = jax.random.uniform(kb, (1, fan_out), jnp.float32, -bound, bound)
        return w, b

    w1, b1 = lin(ks[0], ks[1], total_dims, hidden_dim)
    w2, b2 = lin(ks[2], ks[3], hidden_dim, hidden_dim)
    w3, b3 = lin(ks[4], ks[5], hidden_dim, 1)
    return dict(w1=w1, b1=b1, w2=w2, b2=b2, w3=w3, b3=b3)


def qvalue_ref(x, p, matmul_dtype=jnp.float32):
    """Pure-JAX reference; matmul_dtype mirrors the kernel's MXU operand dtype."""
    w1 = p["w1"].astype(matmul_dtype)
    w2 = p["w2"].astype(matmul_dtype)
    h1 = jnp.maximum(jnp.dot(x.astype(matmul_dtype), w1,
                             preferred_element_type=jnp.float32) + p["b1"], 0.0)
    h2 = jnp.maximum(jnp.dot(h1.astype(matmul_dtype), w2,
                             preferred_element_type=jnp.float32) + p["b2"], 0.0)
    return jnp.dot(h2, p["w3"], preferred_element_type=jnp.float32) + p["b3"]


if __name__ == "__main__":
    # Small shapes consistent with the module; B=200 with TB=128 exercises
    # both the two-step batch grid (keeps a v7x megacore busy) and the ragged
    # (masked) final block path.
    B, TOTAL_DIMS, HIDDEN = 200, 24, 32

    key = jax.random.PRNGKey(0)
    k_x, k_p = jax.random.split(key)
    x = jax.random.normal(k_x, (B, TOTAL_DIMS), jnp.float32)
    params = init_params(k_p, TOTAL_DIMS, HIDDEN)

    out = qvalue_forward(x, params)
    out = jax.block_until_ready(out)
    assert out.shape == (B, 1)

    # Dtype-matched reference (bf16 MXU operands, f32 accumulate): tight check.
    ref_bf16 = qvalue_ref(x, params, matmul_dtype=jnp.bfloat16)
    assert jnp.allclose(out, ref_bf16, atol=5e-3, rtol=5e-3)

    # Full-f32 reference: loose semantic sanity check (bf16 operand rounding).
    ref_f32 = qvalue_ref(x, params, matmul_dtype=jnp.float32)
    assert jnp.allclose(out, ref_f32, atol=2e-1, rtol=0.0)

    print("KERNEL_OK")
</pallas_src>

<mosaic_0001>
module attributes {stable_mosaic.version = 11 : i64} {
  func.func @qvalue_kernel(%arg0: i32, %arg1: memref<128x24xf32, #tpu.memory_space<vmem>>, %arg2: memref<24x32xbf16, #tpu.memory_space<vmem>>, %arg3: memref<1x32xf32, #tpu.memory_space<vmem>>, %arg4: memref<32x32xbf16, #tpu.memory_space<vmem>>, %arg5: memref<1x32xf32, #tpu.memory_space<vmem>>, %arg6: memref<1x32xf32, #tpu.memory_space<vmem>>, %arg7: memref<1x1xf32, #tpu.memory_space<vmem>>, %arg8: memref<1x1x128xf32, #tpu.memory_space<vmem>>) attributes {dimension_semantics = [#tpu.dimension_semantics<parallel>], iteration_bounds = array<i64: 2>, scalar_prefetch = 0 : i64, scratch_operands = 0 : i64, tpu.core_type = #tpu.core_type<tc>, window_params = [{transform_indices = @transform_0, window_bounds = array<i64: 128, 24>}, {pipeline_mode = #tpu.pipeline_mode<synchronous>, transform_indices = @transform_1, window_bounds = array<i64: 24, 32>}, {pipeline_mode = #tpu.pipeline_mode<synchronous>, transform_indices = @transform_2, window_bounds = array<i64: 1, 32>}, {pipeline_mode = #tpu.pipeline_mode<synchronous>, transform_indices = @transform_3, window_bounds = array<i64: 32, 32>}, {pipeline_mode = #tpu.pipeline_mode<synchronous>, transform_indices = @transform_4, window_bounds = array<i64: 1, 32>}, {pipeline_mode = #tpu.pipeline_mode<synchronous>, transform_indices = @transform_5, window_bounds = array<i64: 1, 32>}, {pipeline_mode = #tpu.pipeline_mode<synchronous>, transform_indices = @transform_6, window_bounds = array<i64: 1, 1>}, {transform_indices = @transform_7, window_bounds = array<i64: 1, 1, 128>}]} {
    %c0 = arith.constant 0 : index
    %c0_0 = arith.constant 0 : index
    %0 = vector.load %arg1[%c0, %c0_0] : memref<128x24xf32, #tpu.memory_space<vmem>>, vector<128x24xf32>
    %1 = arith.truncf %0 : vector<128x24xf32> to vector<128x24xbf16>
    %c0_1 = arith.constant 0 : index
    %c0_2 = arith.constant 0 : index
    %2 = vector.load %arg2[%c0_1, %c0_2] : memref<24x32xbf16, #tpu.memory_space<vmem>>, vector<24x32xbf16>
    %cst = arith.constant dense<0.000000e+00> : vector<128x32xf32>
    %3 = tpu.matmul %1, %2, %cst {dimension_numbers = #tpu.dot_dimension_numbers<[1], [0], [0], [1], [0, 0, 1, 1], [], []>} : vector<128x24xbf16>, vector<24x32xbf16>, vector<128x32xf32> -> vector<128x32xf32>
    %c0_3 = arith.constant 0 : index
    %c0_4 = arith.constant 0 : index
    %4 = vector.load %arg3[%c0_3, %c0_4] : memref<1x32xf32, #tpu.memory_space<vmem>>, vector<1x32xf32>
    %5 = vector.broadcast %4 : vector<1x32xf32> to vector<128x32xf32>
    %6 = arith.addf %3, %5 : vector<128x32xf32>
    %cst_5 = arith.constant 0.000000e+00 : f32
    %7 = vector.broadcast %cst_5 : f32 to vector<128x32xf32>
    %8 = arith.maximumf %6, %7 : vector<128x32xf32>
    %9 = arith.truncf %8 : vector<128x32xf32> to vector<128x32xbf16>
    %c0_6 = arith.constant 0 : index
    %c0_7 = arith.constant 0 : index
    %10 = vector.load %arg4[%c0_6, %c0_7] : memref<32x32xbf16, #tpu.memory_space<vmem>>, vector<32x32xbf16>
    %cst_8 = arith.constant dense<0.000000e+00> : vector<128x32xf32>
    %11 = tpu.matmul %9, %10, %cst_8 {dimension_numbers = #tpu.dot_dimension_numbers<[1], [0], [0], [1], [0, 0, 1, 1], [], []>} : vector<128x32xbf16>, vector<32x32xbf16>, vector<128x32xf32> -> vector<128x32xf32>
    %c0_9 = arith.constant 0 : index
    %c0_10 = arith.constant 0 : index
    %12 = vector.load %arg5[%c0_9, %c0_10] : memref<1x32xf32, #tpu.memory_space<vmem>>, vector<1x32xf32>
    %13 = vector.broadcast %12 : vector<1x32xf32> to vector<128x32xf32>
    %14 = arith.addf %11, %13 : vector<128x32xf32>
    %cst_11 = arith.constant 0.000000e+00 : f32
    %15 = vector.broadcast %cst_11 : f32 to vector<128x32xf32>
    %16 = arith.maximumf %14, %15 : vector<128x32xf32>
    %c0_12 = arith.constant 0 : index
    %c0_13 = arith.constant 0 : index
    %17 = vector.load %arg6[%c0_12, %c0_13] : memref<1x32xf32, #tpu.memory_space<vmem>>, vector<1x32xf32>
    %cst_14 = arith.constant dense<0.000000e+00> : vector<1x128xf32>
    %18 = tpu.matmul %17, %16, %cst_14 {dimension_numbers = #tpu.dot_dimension_numbers<[1], [1], [0], [0], [0, 0, 1, 0], [], []>} : vector<1x32xf32>, vector<128x32xf32>, vector<1x128xf32> -> vector<1x128xf32>
    %c0_15 = arith.constant 0 : index
    %c0_16 = arith.constant 0 : index
    %19 = vector.load %arg7[%c0_15, %c0_16] : memref<1x1xf32, #tpu.memory_space<vmem>>, vector<1x1xf32>
    %20 = vector.broadcast %19 : vector<1x1xf32> to vector<1x128xf32>
    %21 = arith.addf %18, %20 : vector<1x128xf32>
    %22 = vector.shape_cast %21 : vector<1x128xf32> to vector<1x1x128xf32>
    %c0_17 = arith.constant 0 : index
    %c0_18 = arith.constant 0 : index
    %c0_19 = arith.constant 0 : index
    %23 = vector.load %arg8[%c0_17, %c0_18, %c0_19] : memref<1x1x128xf32, #tpu.memory_space<vmem>>, vector<1x1x128xf32>
    tpu.vector_store %arg8[%c0_17, %c0_18, %c0_19], %22 {strides = array<i32>} : memref<1x1x128xf32, #tpu.memory_space<vmem>>, vector<1x1x128xf32>,
    return
  }
  func.func @transform_0(%arg0: i32) -> (i32, i32) {
    %c0_i32 = arith.constant 0 : i32
    %c0_i32_0 = arith.constant 0 : i32
    return %arg0, %c0_i32 : i32, i32
  }
  func.func @transform_1(%arg0: i32) -> (i32, i32) {
    %c0_i32 = arith.constant 0 : i32
    %c0_i32_0 = arith.constant 0 : i32
    %c0_i32_1 = arith.constant 0 : i32
    return %c0_i32, %c0_i32_0 : i32, i32
  }
  func.func @transform_2(%arg0: i32) -> (i32, i32) {
    %c0_i32 = arith.constant 0 : i32
    %c0_i32_0 = arith.constant 0 : i32
    %c0_i32_1 = arith.constant 0 : i32
    return %c0_i32, %c0_i32_0 : i32, i32
  }
  func.func @transform_3(%arg0: i32) -> (i32, i32) {
    %c0_i32 = arith.constant 0 : i32
    %c0_i32_0 = arith.constant 0 : i32
    %c0_i32_1 = arith.constant 0 : i32
    return %c0_i32, %c0_i32_0 : i32, i32
  }
  func.func @transform_4(%arg0: i32) -> (i32, i32) {
    %c0_i32 = arith.constant 0 : i32
    %c0_i32_0 = arith.constant 0 : i32
    %c0_i32_1 = arith.constant 0 : i32
    return %c0_i32, %c0_i32_0 : i32, i32
  }
  func.func @transform_5(%arg0: i32) -> (i32, i32) {
    %c0_i32 = arith.constant 0 : i32
    %c0_i32_0 = arith.constant 0 : i32
    %c0_i32_1 = arith.constant 0 : i32
    return %c0_i32, %c0_i32_0 : i32, i32
  }
  func.func @transform_6(%arg0: i32) -> (i32, i32) {
    %c0_i32 = arith.constant 0 : i32
    %c0_i32_0 = arith.constant 0 : i32
    %c0_i32_1 = arith.constant 0 : i32
    return %c0_i32, %c0_i32_0 : i32, i32
  }
  func.func @transform_7(%arg0: i32) -> (i32, i32, i32) {
    %c0_i32 = arith.constant 0 : i32
    %c0_i32_0 = arith.constant 0 : i32
    %c0_i32_1 = arith.constant 0 : i32
    return %arg0, %c0_i32, %c0_i32_0 : i32, i32, i32
  }
}

</mosaic_0001>

<bundles_post_ra>
// kernel: tpu_custom_call.1
= control target key start
LH: loop header
LB: loop body
LE: loop exit
PB: predicated region body
PF: predicated region fallthrough
CT: control target
= control target key end

     0   :  { %s1394_s0 = inlined_call_operand.vmem [shape: f32[200,24], index: 0, kind: input, shape index: {}]   ;;  %s1395_s1 = inlined_call_operand.vmem [shape: bf16[24,32], index: 1, kind: input, shape index: {}]   ;;  %s1396_s2 = inlined_call_operand.vmem [shape: f32[1,32], index: 2, kind: input, shape index: {}]   ;;  %s1397_s3 = inlined_call_operand.vmem [shape: bf16[32,32], index: 3, kind: input, shape index: {}]   ;;  %s1398_s4 = inlined_call_operand.vmem [shape: f32[1,32], index: 4, kind: input, shape index: {}]   ;;  %s1399_s5 = inlined_call_operand.vmem [shape: f32[1,32], index: 5, kind: input, shape index: {}]   ;;  %s1400_s6 = inlined_call_operand.<no memory space> [shape: f32[1,1], index: 6, kind: input, shape index: {}]   ;;  %s1401_s7 = inlined_call_operand.hbm [shape: f32[2,1,128], index: 7, kind: output, shape index: {}]  }
   0x1   :  { %v12_v0 = vstv %s1400_s6 }
   0x2   :  { %13 = vst [vmem:[#allocation2] sm:$0x1] %v12_v0 }
   0x3   :  { %14 = vsyncpa [#allocation4], 0 }
   0x4   :  { %16 = vsyncpa [#allocation4 + $0x1], 0  ;;  %s1209_s26 = smov 0   ;;  %s1211_s27 = smov 0  }
   0x5   :  { %s1213_s28 = smov 0   ;;  %s1215_s29 = smov 0  }
   0x6 LB: > { %s855_s6 = sadd.s32 4294967295, %s1159_s29   ;;  %s856_s30 = sadd.s32 4294967294, %s1159_s29   ;;  %s1159_s29 = sphi %s1215_s29, %s1409_s29   ;;  %s1155_s28 = sphi %s1213_s28, %s1408_s28   ;;  %s1151_s27 = sphi %s1211_s27, %s1407_s27   ;;  %s1147_s26 = sphi %s1209_s26, %s1406_s26  }
   0x7   : > { %s1232_s8 = sadd.s32 1, %s1159_s29   ;;  %s181_s9 = sadd.s32 1, %s1155_s28 }
   0x8   : > { %s178_s10 = ssub.s32 %s1159_s29, %s1232_s8  ;;  %p191_p0 = scmp.ne.s32.totalorder %s1155_s28, %s1151_s27 }
   0x9   : > { %p179_p1 = scmp.eq.s32.totalorder %s178_s10, 0  ;;  %p192_p2 = scmp.eq.s32.totalorder %s855_s6, 1 }
   0xa   : > { %p197_p3 = scmp.ne.s32.totalorder %s1151_s27, %s1147_s26  ;;  %p198_p4 = scmp.eq.s32.totalorder %s856_s30, 1 }
   0xb   : > { %s1242_s11 = scalar_select %p179_p1, %s1155_s28, %s181_s9  }
   0xc   : > { %p1244_p5 = por %p192_p2, %p191_p0  ;;  %p1248_p6 = por %p198_p4, %p197_p3 }
   0xd   : > { %p859_p7 = scmp.ge.s32.totalorder %s1159_s29, 1  ;;  %p251_p8 = scmp.lt.s32.totalorder %s1159_s29, 3 }
   0xf   : > { %p252_p9 = pnand %p859_p7, %p251_p8 }
  0x10   : > { %v1093_v1 = vld [vmem:[%s1395_s1] sm:$0xff] (!%p252_p9)   ;;  %v1094_v2 = vld [vmem:[%s1395_s1 + $0x8] ss:$0 sps:$4 sm:$0xff] (!%p252_p9)   ;;  %vm369_vm0 = vcmask (!%p252_p9), 1043456   ;;  %s1260_s18 = sshll.u32 (!%p252_p9), %s855_s6, 4  ;;  %vm344_vm1 = vcmask (!%p252_p9), 195584  }
  0x11   : > { %255 = sbr.rel (%p252_p9) target bundleno = 766 (0x2fe), region = 48  ;;  %941 = vmatprep.subr.bf16.mxu1 (!%p252_p9), %v1093_v1  ;;  %p291_p10 = scmp.lt.s32.totalorder (!%p252_p9), %s1260_s18, 24  ;;  %v371_v3 = vsel (!%p252_p9), %vm369_vm0, %v1094_v2, 0  ;;  %v1095_v4 = vld [vmem:[%s1397_s3] sm:$0xff] (!%p252_p9)   ;;  %v1096_v14 = vld [vmem:[%s1397_s3 + $0x8] sm:$0xff] (!%p252_p9)   ;;  %vm517_vm2 = vcmask (!%p252_p9), 261120  }
  0x12   : > { %942 = vmatpush3.bf16.msra.mxu1 (!%p252_p9), %v1093_v1  ;;  %v862_v30 = vld [vmem:[%s1396_s2] ss:$0 sm:$0xff] (!%p252_p9)  ;;  %vm1162_vm3 = vmmov (!%p252_p9), 0   ;;  %vm1316_vm4 = vmpackc.low (!%p252_p9), %vm517_vm2, %vm517_vm2  ;;  %s1352_s24 = scalar_lea.hbm (!%p252_p9), %s1401_s7, %s1260_s18  ;;  %s1165_s30 = smov (!%p252_p9), [#allocation3]  }
  0x13   : > { %1048 = vmatprep.subr.msk.bf16.mxu1 (!%p252_p9), %vm369_vm0, %v1094_v2  ;;  %s1101_s9 = sshll.u32 (!%p252_p9), %s1165_s30, 4  ;;  %s1102_s9 = int_to_ptr.vmem [resolvable:$false] %s1101_s9 }
  0x14   : > { %s1103_s10 = scalar_lea.vmem (!%p252_p9), %s1102_s9, 32 }
  0x16   : > { %944 = vmatpush3.bf16.msra.mxu1 (!%p252_p9), %v371_v3 }
  0x17   : > { %961 = vmatprep.subr.bf16.mxu1 (!%p252_p9), %v1095_v4 }
  0x18   : > { %s292_s19 = scalar_select %p291_p10, %s1260_s18, 24 }
  0x1a   : > { %s861_s22 = sshll.u32 %s292_s19, 3  ;;  %s284_s19 = sand.u32 1, %s1151_s27  }
  0x1b   : > { %s1270_s25 = scalar_lea.vmem %s1394_s0, %s861_s22  ;;  %s285_s20 = scalar_lea.vmem [#allocation3], %s284_s19 }
  0x1c   : > { %v301_v5 = vld [vmem:[%s1270_s25] sm:$0xff]  ;;  %v302_v6 = vld [vmem:[%s1270_s25 + $0x8] sm:$0xff]  ;;  %v303_v7 = vld [vmem:[%s1270_s25 + $0x10] sm:$0xff]  ;;  %s801_s21 = sshll.u32 %s285_s20, 4  ;;  %s1354_s21 = int_to_ptr.vmem [resolvable:$true] %s801_s21 }
  0x1d   : > { %v317_v8 = vpack.c.bf16 %v302_v6, %v301_v5  ;;  %v304_v9 = vld [vmem:[%s1270_s25 + $0x18] sm:$0xff]  ;;  %v305_v10 = vld [vmem:[%s1270_s25 + $0x20] sm:$0xff]  ;;  %v306_v11 = vld [vmem:[%s1270_s25 + $0x28] sm:$0xff]  ;;  %s1097_s6 = scalar_lea.vmem %s1354_s21, 16  ;;  %p1104_p0 = scmp.lt.s32.totalorder %s1354_s21, %s1102_s9 }
  0x1e   : > { %v318_v12 = vpack.c.bf16 %v304_v9, %v303_v7  ;;  %v319_v13 = vpack.c.bf16 %v306_v11, %v305_v10  ;;  %v307_v15 = vld [vmem:[%s1270_s25 + $0x30] sm:$0xff]  ;;  %v308_v16 = vld [vmem:[%s1270_s25 + $0x38] sm:$0xff]  ;;  %v309_v17 = vld [vmem:[%s1270_s25 + $0x40] sm:$0xff]  ;;  %p1098_p11 = scmp.ne.s32.totalorder %s1354_s21, %s1097_s6  ;;  %p1105_p1 = scmp.lt.s32.totalorder %s1103_s10, %s1097_s6 }
  0x1f   : > { %945 = vmatprep.mubr.msk.bf16.mxu1 %vm344_vm1, %v317_v8  ;;  %v310_v18 = vld [vmem:[%s1270_s25 + $0x48] sm:$0xff]  ;;  %v320_v19 = vpack.c.bf16 %v308_v16, %v307_v15  ;;  %v311_v21 = vld [vmem:[%s1270_s25 + $0x50] sm:$0xff]  ;;  %v312_v22 = vld [vmem:[%s1270_s25 + $0x58] sm:$0xff] }
  0x20   : > { %946 = vmatmul.mubr.msk.bf16.vlgmr.msra.gmra.mrb[0].mxu1 %vm344_vm1, %v318_v12  ;;  %v321_v20 = vpack.c.bf16 %v310_v18, %v309_v17  ;;  %v313_v23 = vld [vmem:[%s1270_s25 + $0x60] sm:$0xff]  ;;  %v314_v24 = vld [vmem:[%s1270_s25 + $0x68] sm:$0xff]  ;;  %v322_v25 = vpack.c.bf16 %v312_v22, %v311_v21  ;;  %v315_v27 = vld [vmem:[%s1270_s25 + $0x70] sm:$0xff]  ;;  %p1099_p12 = pnand %p1098_p11, %p1244_p5  ;;  %p1106_p2 = por %p1105_p1, %p1104_p0 }
  0x21   : > { %949 = vmatprep.mubr.msk.bf16.mxu1 %vm344_vm1, %v319_v13  ;;  %962 = vmatpush3.bf16.msra.mxu1 %v1095_v4  ;;  %v323_v26 = vpack.c.bf16 %v314_v24, %v313_v23  ;;  %v316_v28 = vld [vmem:[%s1270_s25 + $0x78] sm:$0xff]  ;;  %v1161_v23 = vmov 0.0|0.0   ;;  %v1163_v24 = vmov 0.0   ;;  %s789_s25 = scalar_lea.sflag [#allocation4], %s284_s19 }
  0x22   : > { %963 = vmatprep.subr.bf16.mxu1 %v1096_v14  ;;  %v324_v29 = vpack.c.bf16 %v316_v28, %v315_v27  ;;  %1016 = vmatprep.subr.bf16.mxu0 %v1161_v23  ;;  %v873_v27 = vld [vmem:[%s1398_s4] ss:$0 sm:$0xff]  ;;  %p1100_p13 = pneg %p1099_p12 }
  0x23   : > { %1013 = vmatprep.mubr.msk.f32.mxu0 %vm1162_vm3, %v1163_v24 }
  0x24   : > { %p1107_p3 = pnand %p1106_p2, %p1100_p13 }
  0x25   : > { %964 = vmatpush3.bf16.msra.mxu1 %v1096_v14 }
  0x28   : > { %950 = vmatmul.mubr.msk.bf16.gmra.mrb[4].mxu1 %vm344_vm1, %v320_v19 }
  0x29   : > { %953 = vmatprep.mubr.msk.bf16.mxu1 %vm344_vm1, %v321_v20 }
  0x30   : > { %954 = vmatmul.mubr.msk.bf16.gmra.mrb[8].mxu1 %vm344_vm1, %v322_v25  ;;  %v656_v25 = vld [vmem:[#allocation2] sm:$0x1] }
  0x31   : > { %957 = vmatprep.mubr.msk.bf16.mxu1 %vm344_vm1, %v323_v26  ;;  %v1164_v26 = vmov 0  }
  0x32   : > { %1092 = vset.pattern.permute.xlu0 %v1164_v26 }
  0x33   : > { %659 = vperm.xlu0 %1092, %v656_v25  }
  0x38   : > { %958 = vmatmul.mubr.msk.bf16.gmra.mrb[12].mxu1 %vm344_vm1, %v324_v29 }
  0xb2   : > { %v660_v26 = vpop.permute.xlu0 %659 }
  0xf3   : > { %v947_v31 = vpop.f32.mrb[0].mxu1 }
  0xf4   : > { %v416_v32 = vadd.f32 %v947_v31, %v862_v30  ;;  %v407_v33 = vpop.f32.mrb[1].mxu1 }
  0xf5   : > { %v408_v34 = vadd.f32 %v862_v30, %v407_v33  ;;  %v948_v35 = vpop.f32.mrb[2].mxu1 }
  0xf6   : > { %v419_v36 = vadd.f32 %v948_v35, %v862_v30  ;;  %v410_v37 = vpop.f32.mrb[3].mxu1  ;;  %v472_v39 = vmax.f32 %v416_v32, 0.0 }
  0xf7   : > { %v411_v38 = vadd.f32 %v862_v30, %v410_v37  ;;  %v470_v41 = vmax.f32 %v408_v34, 0.0 }
  0xf8   : > { %v473_v40 = vmax.f32 %v419_v36, 0.0 }
  0xf9   : > { %v471_v42 = vmax.f32 %v411_v38, 0.0 }
  0xfa   : > { %v487_v43 = vpack.c.bf16 %v473_v40, %v472_v39 }
  0xfb   : > { %v486_v44 = vpack.c.bf16 %v471_v42, %v470_v41  ;;  %v951_v45 = vpop.f32.mrb[4].mxu1 }
  0xfc   : > { %v432_v46 = vadd.f32 %v951_v45, %v862_v30  ;;  %v423_v47 = vpop.f32.mrb[5].mxu1 }
  0xfd   : > { %v424_v48 = vadd.f32 %v862_v30, %v423_v47  ;;  %965 = vmatprep.mubr.msk.bf16.mxu1 %vm517_vm2, %v486_v44  ;;  %v952_v49 = vpop.f32.mrb[6].mxu1 }
  0xfe   : > { %v476_v50 = vmax.f32 %v432_v46, 0.0  ;;  %v435_v51 = vadd.f32 %v952_v49, %v862_v30  ;;  %966 = vmatmul.mubr.msk.bf16.vlgmr.msra.gmra.mrb[16].mxu1 %vm517_vm2, %v487_v43  ;;  %v426_v52 = vpop.f32.mrb[7].mxu1 }
  0xff   : > { %v474_v53 = vmax.f32 %v424_v48, 0.0  ;;  %v427_v54 = vadd.f32 %v862_v30, %v426_v52 }
 0x100   : > { %v477_v55 = vmax.f32 %v435_v51, 0.0 }
 0x101   : > { %v475_v56 = vmax.f32 %v427_v54, 0.0 }
 0x102   : > { %v489_v57 = vpack.c.bf16 %v477_v55, %v476_v50 }
 0x103   : > { %v488_v58 = vpack.c.bf16 %v475_v56, %v474_v53  ;;  %v955_v59 = vpop.f32.mrb[8].mxu1 }
 0x104   : > { %v448_v60 = vadd.f32 %v955_v59, %v862_v30  ;;  %v439_v61 = vpop.f32.mrb[9].mxu1 }
 0x105   : > { %969 = vmatprep.mubr.msk.bf16.mxu1 %vm517_vm2, %v488_v58  ;;  %v440_v62 = vadd.f32 %v862_v30, %v439_v61  ;;  %v956_v63 = vpop.f32.mrb[10].mxu1 }
 0x106   : > { %970 = vmatmul.mubr.msk.bf16.gmra.mrb[20].mxu1 %vm517_vm2, %v489_v57  ;;  %v480_v0 = vmax.f32 %v448_v60, 0.0  ;;  %v451_v1 = vadd.f32 %v956_v63, %v862_v30  ;;  %v442_v2 = vpop.f32.mrb[11].mxu1 }
 0x107   : > { %v478_v3 = vmax.f32 %v440_v62, 0.0  ;;  %v443_v4 = vadd.f32 %v862_v30, %v442_v2 }
 0x108   : > { %v481_v5 = vmax.f32 %v451_v1, 0.0 }
 0x109   : > { %v479_v6 = vmax.f32 %v443_v4, 0.0 }
 0x10a   : > { %v491_v7 = vpack.c.bf16 %v481_v5, %v480_v0 }
 0x10b   : > { %v490_v8 = vpack.c.bf16 %v479_v6, %v478_v3  ;;  %v959_v9 = vpop.f32.mrb[12].mxu1 }
 0x10c   : > { %v464_v10 = vadd.f32 %v959_v9, %v862_v30  ;;  %v455_v11 = vpop.f32.mrb[13].mxu1 }
 0x10d   : > { %973 = vmatprep.mubr.msk.bf16.mxu1 %vm517_vm2, %v490_v8  ;;  %v456_v12 = vadd.f32 %v862_v30, %v455_v11  ;;  %v960_v13 = vpop.f32.mrb[14].mxu1 }
 0x10e   : > { %974 = vmatmul.mubr.msk.bf16.gmra.mrb[24].mxu1 %vm517_vm2, %v491_v7  ;;  %v484_v14 = vmax.f32 %v464_v10, 0.0  ;;  %v467_v15 = vadd.f32 %v960_v13, %v862_v30  ;;  %v458_v16 = vpop.f32.mrb[15].mxu1 }
 0x10f   : > { %v482_v17 = vmax.f32 %v456_v12, 0.0  ;;  %v459_v18 = vadd.f32 %v862_v30, %v458_v16 }
 0x110   : > { %v485_v19 = vmax.f32 %v467_v15, 0.0 }
 0x111   : > { %v483_v20 = vmax.f32 %v459_v18, 0.0 }
 0x112   : > { %v493_v21 = vpack.c.bf16 %v485_v19, %v484_v14 }
 0x113   : > { %v492_v22 = vpack.c.bf16 %v483_v20, %v482_v17 }
 0x115   : > { %977 = vmatprep.mubr.msk.bf16.mxu1 %vm517_vm2, %v492_v22  ;;  %v662_v22 = vlaneseq }
 0x116   : > { %978 = vmatmul.mubr.msk.bf16.gmra.mrb[28].mxu1 %vm517_vm2, %v493_v21  ;;  %v655_v21 = vld [vmem:[%s1399_s5] sm:$0x1] }
 0x117   : > { %v663_v24 = vshrl.u32 %v662_v22, 7 }
 0x119   : > { %v664_v25 = vsub.s32 0, %v663_v24 }
 0x1d1   : > { %v967_v28 = vpop.f32.mrb[16].mxu1 }
 0x1d2   : > { %v585_v29 = vadd.f32 %v967_v28, %v873_v27  ;;  %v576_v30 = vpop.f32.mrb[17].mxu1 }
 0x1d3   : > { %v577_v31 = vadd.f32 %v873_v27, %v576_v30  ;;  %v968_v32 = vpop.f32.mrb[18].mxu1 }
 0x1d4   : > { %v588_v33 = vadd.f32 %v968_v32, %v873_v27  ;;  %v579_v34 = vpop.f32.mrb[19].mxu1  ;;  %v641_v36 = vmax.f32 %v585_v29, 0.0 }
 0x1d5   : > { %v580_v35 = vadd.f32 %v873_v27, %v579_v34  ;;  %v639_v38 = vmax.f32 %v577_v31, 0.0 }
 0x1d6   : > { %v642_v37 = vmax.f32 %v588_v33, 0.0 }
 0x1d7   : > { %v640_v39 = vmax.f32 %v580_v35, 0.0 }
 0x1d8   : > { %v1021_v40 = vpack.c.bf16 %v642_v37, %v641_v36 }
 0x1d9   : > { %v1017_v42 = vpack.c.bf16 %v640_v39, %v639_v38  ;;  %v971_v43 = vpop.f32.mrb[20].mxu1 }
 0x1da   : > { %v601_v44 = vadd.f32 %v971_v43, %v873_v27  ;;  %v592_v45 = vpop.f32.mrb[21].mxu1 }
 0x1db   : > { %v593_v46 = vadd.f32 %v873_v27, %v592_v45  ;;  %1019 = vmatpush3.bf16.xpose.msk.msra.mxu0 %vm1316_vm4, %v1017_v42  ;;  %v972_v47 = vpop.f32.mrb[22].mxu1 }
 0x1dc   : > { %v645_v48 = vmax.f32 %v601_v44, 0.0  ;;  %v604_v49 = vadd.f32 %v972_v47, %v873_v27  ;;  %v595_v50 = vpop.f32.mrb[23].mxu1  ;;  %1020 = vmatprep.subr.bf16.mxu0 %v1161_v23 }
 0x1dd   : > { %v643_v51 = vmax.f32 %v593_v46, 0.0  ;;  %v596_v52 = vadd.f32 %v873_v27, %v595_v50 }
 0x1de   : > { %v646_v53 = vmax.f32 %v604_v49, 0.0 }
 0x1df   : > { %v644_v54 = vmax.f32 %v596_v52, 0.0 }
 0x1e0   : > { %v1029_v55 = vpack.c.bf16 %v646_v53, %v645_v48 }
 0x1e1   : > { %v1025_v56 = vpack.c.bf16 %v644_v54, %v643_v51  ;;  %v975_v57 = vpop.f32.mrb[24].mxu1 }
 0x1e2   : > { %v617_v58 = vadd.f32 %v975_v57, %v873_v27  ;;  %v608_v59 = vpop.f32.mrb[25].mxu1 }
 0x1e3   : > { %1023 = vmatpush3.bf16.xpose.msk.msra.mxu0 %vm1316_vm4, %v1021_v40  ;;  %v609_v60 = vadd.f32 %v873_v27, %v608_v59  ;;  %v976_v61 = vpop.f32.mrb[26].mxu1 }
 0x1e4   : > { %v649_v62 = vmax.f32 %v617_v58, 0.0  ;;  %1024 = vmatprep.subr.bf16.mxu0 %v1161_v23  ;;  %v620_v63 = vadd.f32 %v976_v61, %v873_v27  ;;  %v611_v0 = vpop.f32.mrb[27].mxu1 }
 0x1e5   : > { %v647_v1 = vmax.f32 %v609_v60, 0.0  ;;  %v612_v2 = vadd.f32 %v873_v27, %v611_v0 }
 0x1e6   : > { %v650_v3 = vmax.f32 %v620_v63, 0.0 }
 0x1e7   : > { %v648_v4 = vmax.f32 %v612_v2, 0.0 }
 0x1e8   : > { %v1037_v5 = vpack.c.bf16 %v650_v3, %v649_v62 }
 0x1e9   : > { %v1033_v6 = vpack.c.bf16 %v648_v4, %v647_v1  ;;  %v979_v7 = vpop.f32.mrb[28].mxu1 }
 0x1ea   : > { %v633_v8 = vadd.f32 %v979_v7, %v873_v27  ;;  %v624_v9 = vpop.f32.mrb[29].mxu1 }
 0x1eb   : > { %1027 = vmatpush3.bf16.xpose.msk.msra.mxu0 %vm1316_vm4, %v1025_v56  ;;  %v625_v10 = vadd.f32 %v873_v27, %v624_v9  ;;  %v980_v11 = vpop.f32.mrb[30].mxu1 }
 0x1ec   : > { %1028 = vmatprep.subr.bf16.mxu0 %v1161_v23  ;;  %v653_v12 = vmax.f32 %v633_v8, 0.0  ;;  %v636_v13 = vadd.f32 %v980_v11, %v873_v27  ;;  %v627_v14 = vpop.f32.mrb[31].mxu1 }
 0x1ed   : > { %v651_v15 = vmax.f32 %v625_v10, 0.0  ;;  %v628_v16 = vadd.f32 %v873_v27, %v627_v14  ;;  %v665_v27 = vrot.slane %v660_v26, %v664_v25 }
 0x1ee   : > { %v654_v17 = vmax.f32 %v636_v13, 0.0 }
 0x1ef   : > { %v652_v18 = vmax.f32 %v628_v16, 0.0 }
 0x1f0   : > { %v1045_v19 = vpack.c.bf16 %v654_v17, %v653_v12 }
 0x1f1   : > { %v1041_v20 = vpack.c.bf16 %v652_v18, %v651_v15 }
 0x1f3   : > { %1031 = vmatpush3.bf16.xpose.msk.msra.mxu0 %vm1316_vm4, %v1029_v55 }
 0x1f4   : > { %1032 = vmatprep.subr.bf16.mxu0 %v1161_v23 }
 0x1fb   : > { %1035 = vmatpush3.bf16.xpose.msk.msra.mxu0 %vm1316_vm4, %v1033_v6 }
 0x1fc   : > { %1036 = vmatprep.subr.bf16.mxu0 %v1161_v23 }
 0x203   : > { %1039 = vmatpush3.bf16.xpose.msk.msra.mxu0 %vm1316_vm4, %v1037_v5 }
 0x204   : > { %1040 = vmatprep.subr.bf16.mxu0 %v1161_v23 }
 0x20b   : > { %1043 = vmatpush3.bf16.xpose.msk.msra.mxu0 %vm1316_vm4, %v1041_v20 }
 0x20c   : > { %1044 = vmatprep.subr.bf16.mxu0 %v1161_v23 }
 0x213   : > { %1047 = vmatpush3.bf16.xpose.msk.msra.mxu0 %vm1316_vm4, %v1045_v19 }
 0x21a   : > { %1014 = vmatmul.mubr.msk.f32.vlgmr.msra.gmra.mrb[0].mxu0 %vm517_vm2, %v655_v21 }
 0x2ed   : > { %v783_v28 = vpop.f32.mrb[0].mxu0 }
 0x2ee   : > { %v784_v23 = vadd.f32 %v783_v28, %v665_v27  ;;  %v1015_v29 = vpop.f32.mrb[1].mxu0 }
 0x2f0   : > { %787 = vst [vmem:[%s285_s20] sm:$0x1] %v784_v23 }
 0x2f1   : > { %1110 = shalt.err (!%p1107_p3)
}
 0x2f2   : > { %s1111_s18 = scalar_lea.hbm %s1352_s24, 16  ;;  %s1115_s16 = scalar_lea.hbm %s1401_s7, 32 }
 0x2f3   : > { %p1112_p4 = scmp.ne.s32.totalorder %s1352_s24, %s1111_s18  ;;  %p1116_p9 = scmp.lt.u32.totalorder %s1352_s24, %s1401_s7 }
 0x2f4   : > { %p1117_p10 = scmp.lt.u32.totalorder %s1115_s16, %s1111_s18  ;;  %p1119_p12 = scmp.lt.u32.totalorder %s1111_s18, %s1352_s24 }
 0x2f5   : > { %p1113_p7 = pnand %p1112_p4, %p1244_p5 }
 0x2f6   : > { %p1118_p11 = por %p1117_p10, %p1116_p9 }
 0x2f7   : > { %p1114_p8 = pneg %p1113_p7 }
 0x2f8   : > { %p1120_p13 = por %p1119_p12, %p1118_p11 }
 0x2fa   : > { %p1121_p0 = pnand %p1120_p13, %p1114_p8 }
 0x2fc   : > { %1124 = shalt.err (!%p1121_p0)
}
 0x2fd   : > { %1049 = dma.vmem_to_hbm [thread:$0]  (%p1244_p5), %s1354_s21, 16, %s1352_s24, %s789_s25  }
 0x2fe PF: > { %p1055_p1 = scmp.ge.s32.totalorder %s1159_s29, 2  ;;  %s813_s20 = sand.u32 1, %s1147_s26  }
 0x2ff   : > { %s814_s22 = scalar_lea.sflag [#allocation4], %s813_s20 }
 0x300   : > { %p1052_p2 = pnand %p1055_p1, %p1248_p6 }
 0x302   : > { %1142 = dma.done.wait (!%p1052_p2), %s814_s22, 16  }
 0x303   : > { %1144 = vsyncadd (!%p1052_p2), %s814_s22, 4294967280  ;;  %p19_p3 = scmp.ge.s32.totalorder %s1232_s8, 4   ;;  %s1406_s26 = smov %s1151_s27 }
 0x304   : > { %s1407_s27 = smov %s1155_s28  ;;  %s1408_s28 = smov %s1242_s11 }
 0x305   : > { %s1409_s29 = smov %s1232_s8  ;;  %21 = sbr.rel (!%p19_p3) target bundleno = 6 (0x6), region = 83 }
 0x30c   :  { %818 = vsyncpa [#allocation4], 1 }
 0x30d   :  { %820 = vsyncpa [#allocation4 + $0x1], 1 }

</bundles_post_ra>
